<compile_context>
chip_gen: v6e
topology: v6e:2x2x1
jax: 0.10.0
libtpu: 0.0.40
codegen_flags: <defaults>
</compile_context>

<pallas_src>
import functools

import jax
import jax.numpy as jnp
from jax import lax
from jax.experimental import pallas as pl
from jax.experimental.pallas import tpu as pltpu


# ----------------------------- kernel ---------------------------------------------
def _conv3x3_mxu(src_f32, w_ref, mask_ref, *, W, roll_sign, per_tap):
    """3x3 'same' conv in (channels, pixels) layout driven from the MXU.

    src_f32 : (Cs, Mt) float32 activations, pixels in lanes (whole images per block)
    w_ref   : (Co, 9*Cs) bf16 weights, tap-major columns (BN scale pre-folded)
    mask_ref: (9, Mt) float32 {0,1} validity masks, one row per tap (precomputed)
    returns (Co, Mt) float32
    """
    Cs, Mt = src_f32.shape

    def tap_block(kh, kw):
        off = (kh - 1) * W + (kw - 1)          # shifted[:, m] = src[:, m + off]
        if off == 0:
            shifted = src_f32
        else:
            shifted = pltpu.roll(src_f32, (roll_sign * off) % Mt, axis=1)
        t = kh * 3 + kw
        m = mask_ref[t:t + 1, :]               # (1, Mt) broadcast over channels
        return (shifted * m).astype(jnp.bfloat16)

    if per_tap:
        # Large-C path: 9 accumulated per-tap dots -> ~1x activation VMEM, not 9x.
        acc = None
        for kh in range(3):
            for kw in range(3):
                t = kh * 3 + kw
                p = jnp.dot(w_ref[:, t * Cs:(t + 1) * Cs], tap_block(kh, kw),
                            preferred_element_type=jnp.float32)
                acc = p if acc is None else acc + p
        return acc

    col_t = jnp.concatenate([tap_block(kh, kw) for kh in range(3) for kw in range(3)],
                            axis=0)            # (9*Cs, Mt) bf16
    return jnp.dot(w_ref[...], col_t, preferred_element_type=jnp.float32)


def basic_block_kernel(x_ref, mask_ref, w1_ref, b1_ref, w2_ref, b2_ref,
                       pool_ref, expand_ref, fc1_ref, fc2_ref, out_ref,
                       *, W, roll_sign, per_tap):
    """x_ref/out_ref: (C, Mt) with Mt = imgs*H*W pixels in lanes (lane-dense)."""
    f32 = jnp.float32
    x = x_ref[...].astype(f32)

    # ---- conv1 (BN1 scale folded into weights) -> bias -> relu ---------------------
    h1 = _conv3x3_mxu(x, w1_ref, mask_ref, W=W, roll_sign=roll_sign, per_tap=per_tap)
    h1 = jnp.maximum(h1 + b1_ref[...], 0.0)

    # ---- conv2 (BN2 scale folded into weights) -> bias ------------------------------
    h2 = _conv3x3_mxu(h1, w2_ref, mask_ref, W=W, roll_sign=roll_sign, per_tap=per_tap)
    h2 = h2 + b2_ref[...]

    # ---- SE: per-image global avg pool -> fc1 -> relu -> fc2 -> sigmoid -------------
    # pool / expand are precomputed grid-invariant one-hot matrices (hoisted).
    y = jnp.dot(h2, pool_ref[...], preferred_element_type=f32)            # (C, n_img)
    y = jnp.maximum(jnp.dot(fc1_ref[...], y, preferred_element_type=f32), 0.0)
    y = jax.nn.sigmoid(jnp.dot(fc2_ref[...], y, preferred_element_type=f32))
    se = jnp.dot(y, expand_ref[...], preferred_element_type=f32)          # (C, Mt)

    # ---- residual add + relu; re-read identity here to keep x's live range short ---
    identity = x_ref[...].astype(f32)
    out_ref[...] = jnp.maximum(h2 * se + identity, 0.0).astype(out_ref.dtype)


# ----------------------------- tiling / budgeting -----------------------------------
def _choose_tiling(B, HW, Cin, C, itemsize, target_lanes=2048,
                   budget_bytes=24 * 1024 * 1024):
    """Pick images-per-step so blocks hold whole images, lanes are a multiple of 128,
    and the estimated per-step VMEM stays under budget (v7x: 32 MiB scoped default)."""
    per_tap = (9 * max(Cin, C)) > 2048          # per-tap accumulation for C >= 256

    cands = [i for i in range(1, B + 1) if B % i == 0 and (i * HW) % 128 == 0]
    if not cands:
        cands = [B]                              # full-array lane block is always legal

    def vmem_est(imgs):
        Mt = imgs * HW
        k_rows = max(Cin, C) * (1 if per_tap else 9)
        live_f32 = Mt * (Cin + 2 * C + 1) * 4    # x, h1, h2, se
        im2col = k_rows * Mt * 2                 # bf16 tap blocks
        io = 2 * Mt * (Cin + C) * itemsize       # double-buffered in/out DMA buffers
        return live_f32 + im2col + io

    ok = [i for i in cands if i * HW <= target_lanes and vmem_est(i) <= budget_bytes]
    if ok:
        imgs = max(ok)                           # biggest tile under the lane target
    else:
        fit = [i for i in cands if vmem_est(i) <= budget_bytes]
        imgs = min(fit) if fit else min(cands)
    return imgs, per_tap, vmem_est(imgs)


# ----------------------------- wrapper ----------------------------------------------
def basic_block_pallas(x_nchw, params, *, roll_sign=-1):
    """NCHW in / NCHW out (matches PyTorch BasicBlock.forward)."""
    B, Cin, H, W = x_nchw.shape
    C = params["w1"].shape[-1]
    Cr = params["fc1"].shape[-1]
    assert Cin == C, "BasicBlock with downsample=None requires inplanes == planes"
    HW = H * W
    itemsize = jnp.dtype(x_nchw.dtype).itemsize

    imgs, per_tap, vmem_est = _choose_tiling(B, HW, Cin, C, itemsize)
    Mt = imgs * HW
    grid = (B // imgs,)

    # channels-on-sublanes / pixels-on-lanes layout.
    # TODO(synk): when chaining blocks in a full network, keep activations in this
    # (C, pixels) layout between blocks so these two HBM transposes disappear.
    x_t = jnp.transpose(x_nchw, (1, 0, 2, 3)).reshape(Cin, B * HW)

    # conv weights HWIO -> (Cout, 9*Cin) tap-major; fold BN scale per output row; bf16.
    s1 = params["scale1"].reshape(C, 1)
    b1 = params["bias1"].reshape(C, 1)
    s2 = params["scale2"].reshape(C, 1)
    b2 = params["bias2"].reshape(C, 1)
    w1_t = (jnp.transpose(params["w1"], (3, 0, 1, 2)).reshape(C, 9 * Cin)
            * s1).astype(jnp.bfloat16)
    w2_t = (jnp.transpose(params["w2"], (3, 0, 1, 2)).reshape(C, 9 * C)
            * s2).astype(jnp.bfloat16)

    fc1_t = params["fc1"].T.astype(jnp.float32)   # (Cr, C)
    fc2_t = params["fc2"].T.astype(jnp.float32)   # (C, Cr)

    # Grid-invariant helpers hoisted out of the kernel: per-tap boundary masks and the
    # SE one-hot pooling / broadcast matrices (identical for every block since blocks
    # contain whole images -> wrapped roll lanes are always masked).
    lane = jnp.arange(Mt, dtype=jnp.int32)
    h_idx = (lane % HW) // W
    w_idx = lane % W
    masks = []
    for kh in range(3):
        for kw in range(3):
            dh, dw = kh - 1, kw - 1
            masks.append((h_idx + dh >= 0) & (h_idx + dh < H) &
                         (w_idx + dw >= 0) & (w_idx + dw < W))
    mask = jnp.stack(masks, axis=0).astype(jnp.float32)                    # (9, Mt)

    img_of_lane = lane // HW
    img_ids = jnp.arange(imgs, dtype=jnp.int32)
    pool = (img_of_lane[:, None] == img_ids[None, :]).astype(jnp.float32) / HW  # (Mt, imgs)
    expand = (img_ids[:, None] == img_of_lane[None, :]).astype(jnp.float32)     # (imgs, Mt)

    kernel = functools.partial(basic_block_kernel, W=W, roll_sign=roll_sign,
                               per_tap=per_tap)
    rep = lambda shape: pl.BlockSpec(shape, lambda g: (0, 0))   # grid-invariant params

    # Advisory cost estimate so XLA schedules surrounding ops correctly.
    flops = 2 * B * HW * (9 * Cin * C + 9 * C * C + 2 * C) + 4 * B * C * Cr
    bytes_accessed = ((x_t.size + C * B * HW) * itemsize
                      + (w1_t.size + w2_t.size) * 2
                      + (fc1_t.size + fc2_t.size + mask.size + pool.size
                         + expand.size + 2 * C) * 4)
    cost = pl.CostEstimate(flops=int(flops), transcendentals=int(B * C),
                           bytes_accessed=int(bytes_accessed))

    cp_kwargs = dict(dimension_semantics=("parallel",))
    if vmem_est > 12 * 1024 * 1024:
        cp_kwargs["vmem_limit_bytes"] = int(min(max(2 * vmem_est, 32 << 20), 64 << 20))

    out_t = pl.pallas_call(
        kernel,
        out_shape=jax.ShapeDtypeStruct((C, B * HW), x_nchw.dtype),
        grid=grid,
        in_specs=[
            pl.BlockSpec((Cin, Mt), lambda g: (0, g)),   # activations: lane-blocked
            rep((9, Mt)),                                 # boundary masks
            rep((C, 9 * Cin)), rep((C, 1)),               # conv1 weights / bias
            rep((C, 9 * C)), rep((C, 1)),                 # conv2 weights / bias
            rep((Mt, imgs)), rep((imgs, Mt)),             # SE pool / expand matrices
            rep((Cr, C)), rep((C, Cr)),                   # SE fc weights
        ],
        out_specs=pl.BlockSpec((C, Mt), lambda g: (0, g)),
        compiler_params=pltpu.CompilerParams(**cp_kwargs),
        cost_estimate=cost,
    )(x_t, mask, w1_t, b1, w2_t, b2, pool, expand, fc1_t, fc2_t)

    out = out_t.reshape(C, B, H, W)
    return jnp.transpose(out, (1, 0, 2, 3))              # back to NCHW


def _roll_convention_probe():
    """pltpu.roll is expected to follow jnp.roll (out[i] = in[(i - shift) % N]).
    Verify once on-device and return the static sign to use for conv shifts."""
    def probe_kernel(x_ref, o_ref):
        o_ref[...] = pltpu.roll(x_ref[...], 1, axis=1)

    x = jnp.broadcast_to(jnp.arange(128, dtype=jnp.float32), (8, 128))
    got = pl.pallas_call(
        probe_kernel,
        out_shape=jax.ShapeDtypeStruct((8, 128), jnp.float32))(x)
    # jnp.roll convention: out[0,1] == in[0,0] == 0  ->  need shift = -off
    return -1 if bool(got[0, 1] == 0.0) else +1


# ----------------------------- reference (plain JAX) --------------------------------
def basic_block_ref(x_nchw, params):
    x = jnp.transpose(x_nchw, (0, 2, 3, 1))  # NHWC
    hi = lax.Precision.HIGHEST

    def conv(v, w):
        return lax.conv_general_dilated(
            v, w, (1, 1), [(1, 1), (1, 1)],
            dimension_numbers=("NHWC", "HWIO", "NHWC"), precision=hi)

    y = conv(x, params["w1"]) * params["scale1"][0] + params["bias1"][0]
    y = jnp.maximum(y, 0.0)
    y = conv(y, params["w2"]) * params["scale2"][0] + params["bias2"][0]
    s = jnp.mean(y, axis=(1, 2))                               # (B, C)
    s = jnp.maximum(jnp.dot(s, params["fc1"], precision=hi), 0.0)
    s = jax.nn.sigmoid(jnp.dot(s, params["fc2"], precision=hi))
    y = y * s[:, None, None, :]
    y = jnp.maximum(y + x, 0.0)
    return jnp.transpose(y, (0, 3, 1, 2))


# ----------------------------- parameter construction -------------------------------
def make_params(key, inplanes, planes, reduction=16):
    cr = max(planes // reduction, 1)
    ks = jax.random.split(key, 12)
    eps = 1e-5

    def fold_bn(kg, kb, km, kv, c):
        gamma = 1.0 + 0.1 * jax.random.normal(kg, (c,), jnp.float32)
        beta = 0.1 * jax.random.normal(kb, (c,), jnp.float32)
        mean = 0.05 * jax.random.normal(km, (c,), jnp.float32)
        var = 1.0 + 0.1 * jnp.abs(jax.random.normal(kv, (c,), jnp.float32))
        scale = gamma / jnp.sqrt(var + eps)
        bias = beta - mean * scale
        return scale.reshape(1, c), bias.reshape(1, c)

    s1, b1 = fold_bn(ks[0], ks[1], ks[2], ks[3], planes)
    s2, b2 = fold_bn(ks[4], ks[5], ks[6], ks[7], planes)
    return {
        "w1": 0.1 * jax.random.normal(ks[8], (3, 3, inplanes, planes), jnp.float32),
        "w2": 0.1 * jax.random.normal(ks[9], (3, 3, planes, planes), jnp.float32),
        "scale1": s1, "bias1": b1,
        "scale2": s2, "bias2": b2,
        # SE fc weights stored as (in, out) so the reference is a plain matmul
        "fc1": 0.3 * jax.random.normal(ks[10], (planes, cr), jnp.float32),
        "fc2": 0.3 * jax.random.normal(ks[11], (cr, planes), jnp.float32),
    }


if __name__ == "__main__":
    B, C, H, W = 2, 16, 8, 8        # inplanes == planes == 16, reduction=16 -> SE hidden = 1
    key = jax.random.PRNGKey(0)
    kx, kp = jax.random.split(key)
    x = jax.random.normal(kx, (B, C, H, W), jnp.float32)   # NCHW, PyTorch convention
    params = make_params(kp, C, C, reduction=16)

    roll_sign = _roll_convention_probe()

    run = jax.jit(functools.partial(basic_block_pallas, params=params,
                                    roll_sign=roll_sign))
    out = run(x)
    jax.block_until_ready(out)

    ref = basic_block_ref(x, params)
    assert out.shape == (B, C, H, W)
    err = float(jnp.max(jnp.abs(out - ref)))
    # bf16 MXU conv operands vs f32 HIGHEST reference -> slightly loosened tolerance
    assert jnp.allclose(out, ref, atol=4e-2, rtol=4e-2), f"max abs err {err}"

    print("KERNEL_OK")
</pallas_src>

<mosaic_0001>
module attributes {stable_mosaic.version = 11 : i64} {
  func.func @probe_kernel(%arg0: memref<8x128xf32, #tpu.memory_space<vmem>>, %arg1: memref<8x128xf32, #tpu.memory_space<vmem>>) attributes {dimension_semantics = [], scalar_prefetch = 0 : i64, scratch_operands = 0 : i64, tpu.core_type = #tpu.core_type<tc>} {
    %c0 = arith.constant 0 : index
    %c0_0 = arith.constant 0 : index
    %0 = vector.load %arg0[%c0, %c0_0] : memref<8x128xf32, #tpu.memory_space<vmem>>, vector<8x128xf32>
    %c1_i32 = arith.constant 1 : i32
    %1 = tpu.dynamic_rotate %0 by %c1_i32 dim 1 : vector<8x128xf32>, i32 -> vector<8x128xf32>
    %c0_1 = arith.constant 0 : index
    %c0_2 = arith.constant 0 : index
    %2 = vector.load %arg1[%c0_1, %c0_2] : memref<8x128xf32, #tpu.memory_space<vmem>>, vector<8x128xf32>
    tpu.vector_store %arg1[%c0_1, %c0_2], %1 {strides = array<i32>} : memref<8x128xf32, #tpu.memory_space<vmem>>, vector<8x128xf32>,
    return
  }
}

</mosaic_0001>

<bundles_post_ra>
// kernel: tpu_custom_call.1
= control target key start
LH: loop header
LB: loop body
LE: loop exit
PB: predicated region body
PF: predicated region fallthrough
CT: control target
= control target key end

     0   :  { %6 = vsyncpa [#allocation3], 0  ;;  %s106_s0 = inlined_call_operand.hbm [shape: f32[8,128], index: 0, kind: input, shape index: {}]   ;;  %s107_s1 = inlined_call_operand.hbm [shape: f32[8,128], index: 1, kind: output, shape index: {}]  }
   0x1   :  { %7 = vsyncpa [#allocation4], 0  ;;  %s87_s6 = smov [#allocation2]  }
   0x2   :  { %s14_s7 = sshll.u32 %s87_s6, 4  ;;  %s15_s7 = int_to_ptr.vmem [resolvable:$true] %s14_s7 }
   0x3   :  { %s51_s8 = scalar_lea.vmem %s15_s7, 128  ;;  %p56_p1 = scmp.lt.s32.totalorder %s15_s7, %s15_s7 }
   0x4   :  { %p52_p0 = scmp.ne.s32.totalorder %s15_s7, %s51_s8  ;;  %p57_p2 = scmp.lt.s32.totalorder %s51_s8, %s51_s8 }
   0x6   :  { %p58_p3 = por %p57_p2, %p56_p1 }
   0x8   :  { %p59_p4 = pnand %p58_p3, %p52_p0 }
   0xa   :  { %62 = shalt.err (!%p59_p4)
}
   0xb   :  { %17 = dma.hbm_to_vmem [thread:$0]  %s106_s0, 128, %s15_s7, [#allocation3]  }
   0xc   :  { %83 = dma.done.wait [#allocation3], 128  }
   0xd   :  { %84 = vsyncadd [#allocation3], 4294967168  ;;  %v21_v0 = vld [vmem:[#allocation2] sm:$0xff]  ;;  %s88_s11 = smov 1   ;;  %s89_s12 = smov [#allocation5]  }
   0xe   :  { %22 = vrot.lane.b32.xlu0 %v21_v0, %s88_s11  ;;  %s31_s13 = sshll.u32 %s89_s12, 4  ;;  %s32_s13 = int_to_ptr.vmem [resolvable:$true] %s31_s13 }
   0xf   :  { %s63_s14 = scalar_lea.vmem %s32_s13, 128  ;;  %p68_p6 = scmp.lt.s32.totalorder %s32_s13, %s32_s13 }
  0x10   :  { %p64_p5 = scmp.ne.s32.totalorder %s32_s13, %s63_s14  ;;  %p69_p7 = scmp.lt.s32.totalorder %s63_s14, %s63_s14 }
  0x12   :  { %p70_p8 = por %p69_p7, %p68_p6 }
  0x14   :  { %p71_p9 = pnand %p70_p8, %p64_p5 }
  0x80   :  { %v23_v1 = vpop.permute.xlu0 %22 }
  0x81   :  { %24 = vst [vmem:[#allocation5] sm:$0xff] %v23_v1 }
  0x82   :  { %74 = shalt.err (!%p71_p9)
}
  0x83   :  { %34 = dma.vmem_to_hbm [thread:$0]  %s32_s13, 128, %s107_s1, [#allocation4]  }
  0x84   :  { %85 = dma.done.wait [#allocation4], 128  }
  0x85   :  { %86 = vsyncadd [#allocation4], 4294967168 }
  0x86   :  { %38 = vsyncpa [#allocation3], 1 }
  0x87   :  { %39 = vsyncpa [#allocation4], 1 }

</bundles_post_ra>
